<compile_context>
chip_gen: v7x
topology: tpu7x:2x2x1
jax: 0.10.0
libtpu: 0.0.40
codegen_flags: <defaults>
</compile_context>

<pallas_src>
import jax
import jax.numpy as jnp
from jax.experimental import pallas as pl
from jax.experimental.pallas import tpu as pltpu


_LANE = 512                 # lane-dense last dim (multiple of 128)
_SUBLANE = 8                # native f32 sublane count
_GROUP = _SUBLANE * _LANE   # elements per row-group (4096)


def _dice_partial_kernel(x_ref, t_ref, inter_ref, sx_ref, st_ref):
    """Accumulates per-shard partial sums into the resident output blocks."""
    j = pl.program_id(1)

    @pl.when(j == 0)
    def _():
        inter_ref[...] = jnp.zeros_like(inter_ref)
        sx_ref[...] = jnp.zeros_like(sx_ref)
        st_ref[...] = jnp.zeros_like(st_ref)

    x = x_ref[...].astype(jnp.float32)    # (tg, 8, LANE)
    t = t_ref[...].astype(jnp.float32)
    s = jax.nn.sigmoid(x)                 # EUP exp + VPU

    # Reduce only over the leading (non-tiled) dim: pure vreg adds on the VPU
    # into the (1, 8, LANE) resident accumulators. No per-step cross-lane
    # (XLU) reductions; those happen once in the wrapper on tiny data.
    inter_ref[...] += jnp.sum(s * t, axis=0)[None]
    sx_ref[...] += jnp.sum(s, axis=0)[None]
    st_ref[...] += jnp.sum(t, axis=0)[None]


def dice_loss(inputs, targets, smooth=1.0, block_groups=128, num_shards=2):
    """DiceLoss forward.

    inputs: logits of any shape (PyTorch uses (B, C, H, W)).
    targets: same number of elements as inputs (PyTorch multiplies them
             elementwise with inputs.flatten(0, 2)).
    """
    x_flat = inputs.reshape(-1)
    t_flat = targets.reshape(-1)
    assert x_flat.size == t_flat.size, "inputs/targets element counts differ"
    total = x_flat.size

    n_groups = -(-total // _GROUP)                     # ceil
    tg = min(int(block_groups), n_groups)              # row-groups per block
    n_blocks_raw = -(-n_groups // tg)
    shards = max(1, min(int(num_shards), n_blocks_raw))
    chunk = tg * shards
    n_groups_pad = -(-n_groups // chunk) * chunk       # multiple of tg*shards
    pad = n_groups_pad * _GROUP - total
    if pad:
        # sigmoid(-1e9) == 0 and target pad == 0 -> padding adds nothing to
        # intersection, sum(sigmoid(x)) or sum(t).
        x_flat = jnp.pad(x_flat, (0, pad), constant_values=-1e9)
        t_flat = jnp.pad(t_flat, (0, pad))

    x3 = x_flat.reshape(n_groups_pad, _SUBLANE, _LANE)
    t3 = t_flat.reshape(n_groups_pad, _SUBLANE, _LANE)

    bps = n_groups_pad // (tg * shards)                # blocks per shard
    grid = (shards, bps)

    def in_map(s, j):
        return (s * bps + j, 0, 0)

    out_sds = jax.ShapeDtypeStruct((shards, _SUBLANE, _LANE), jnp.float32)
    out_spec = pl.BlockSpec((1, _SUBLANE, _LANE), lambda s, j: (s, 0, 0))

    inter_p, sx_p, st_p = pl.pallas_call(
        _dice_partial_kernel,
        out_shape=(out_sds, out_sds, out_sds),
        grid_spec=pltpu.PrefetchScalarGridSpec(
            num_scalar_prefetch=0,
            grid=grid,
            in_specs=[
                pl.BlockSpec((tg, _SUBLANE, _LANE), in_map),
                pl.BlockSpec((tg, _SUBLANE, _LANE), in_map),
            ],
            out_specs=(out_spec, out_spec, out_spec),
        ),
        compiler_params=pltpu.CompilerParams(
            dimension_semantics=("parallel", "arbitrary"),
            vmem_limit_bytes=32 * 1024 * 1024,
        ),
    )(x3, t3)

    # Tiny cross-shard / cross-lane combine (O(shards * 8 * 512) elements).
    smooth = jnp.asarray(smooth, dtype=jnp.float32)
    inter = jnp.sum(inter_p)
    sx = jnp.sum(sx_p)
    st = jnp.sum(st_p)
    dice = (2.0 * inter + smooth) / (sx + st + smooth)
    return 1.0 - dice


def _dice_loss_ref(inputs, targets, smooth=1.0):
    s = jax.nn.sigmoid(inputs.astype(jnp.float32))
    B, C, H, W = inputs.shape
    s = s.reshape(B * C * H, W)
    t = targets.astype(jnp.float32)
    intersection = jnp.sum(s * t)
    dice = (2.0 * intersection + smooth) / (jnp.sum(s) + jnp.sum(t) + smooth)
    return 1.0 - dice


if __name__ == "__main__":
    key = jax.random.PRNGKey(0)
    kx, kt = jax.random.split(key)

    B, C, H, W = 2, 4, 16, 16
    x = jax.random.normal(kx, (B, C, H, W), dtype=jnp.float32)
    # Binary mask targets in the flattened (B*C*H, W) layout (what the torch
    # forward expects for the elementwise product).
    targets = (
        jax.random.uniform(kt, (B * C * H, W), dtype=jnp.float32) > 0.5
    ).astype(jnp.float32)

    loss = jax.block_until_ready(dice_loss(x, targets))
    ref = jax.block_until_ready(_dice_loss_ref(x, targets))

    assert jnp.allclose(loss, ref, rtol=1e-5, atol=1e-6), (loss, ref)
    print("KERNEL_OK")
</pallas_src>

<mosaic_0001>
module attributes {stable_mosaic.version = 11 : i64} {
  func.func @_dice_partial_kernel(%arg0: i32, %arg1: i32, %arg2: memref<1x8x512xf32, #tpu.memory_space<vmem>>, %arg3: memref<1x8x512xf32, #tpu.memory_space<vmem>>, %arg4: memref<1x8x512xf32, #tpu.memory_space<vmem>>, %arg5: memref<1x8x512xf32, #tpu.memory_space<vmem>>, %arg6: memref<1x8x512xf32, #tpu.memory_space<vmem>>) attributes {dimension_semantics = [#tpu.dimension_semantics<parallel>, #tpu.dimension_semantics<arbitrary>], iteration_bounds = array<i64: 1, 1>, scalar_prefetch = 0 : i64, scratch_operands = 0 : i64, tpu.core_type = #tpu.core_type<tc>, window_params = [{transform_indices = @transform_0, window_bounds = array<i64: 1, 8, 512>}, {transform_indices = @transform_1, window_bounds = array<i64: 1, 8, 512>}, {transform_indices = @transform_2, window_bounds = array<i64: 1, 8, 512>}, {transform_indices = @transform_3, window_bounds = array<i64: 1, 8, 512>}, {transform_indices = @transform_4, window_bounds = array<i64: 1, 8, 512>}]} {
    %c0_i32 = arith.constant 0 : i32
    %0 = arith.cmpi eq, %arg1, %c0_i32 : i32
    %1 = arith.extui %0 : i1 to i32
    %c0_i32_0 = arith.constant 0 : i32
    %2 = arith.cmpi ne, %1, %c0_i32_0 : i32
    scf.if %2 {
      %cst_27 = arith.constant 0.000000e+00 : f32
      %26 = vector.broadcast %cst_27 : f32 to vector<1x8x512xf32>
      %c0_28 = arith.constant 0 : index
      %c0_29 = arith.constant 0 : index
      %c0_30 = arith.constant 0 : index
      %27 = vector.load %arg4[%c0_28, %c0_29, %c0_30] : memref<1x8x512xf32, #tpu.memory_space<vmem>>, vector<1x8x512xf32>
      tpu.vector_store %arg4[%c0_28, %c0_29, %c0_30], %26 {strides = array<i32>} : memref<1x8x512xf32, #tpu.memory_space<vmem>>, vector<1x8x512xf32>,
      %cst_31 = arith.constant 0.000000e+00 : f32
      %28 = vector.broadcast %cst_31 : f32 to vector<1x8x512xf32>
      %c0_32 = arith.constant 0 : index
      %c0_33 = arith.constant 0 : index
      %c0_34 = arith.constant 0 : index
      %29 = vector.load %arg5[%c0_32, %c0_33, %c0_34] : memref<1x8x512xf32, #tpu.memory_space<vmem>>, vector<1x8x512xf32>
      tpu.vector_store %arg5[%c0_32, %c0_33, %c0_34], %28 {strides = array<i32>} : memref<1x8x512xf32, #tpu.memory_space<vmem>>, vector<1x8x512xf32>,
      %cst_35 = arith.constant 0.000000e+00 : f32
      %30 = vector.broadcast %cst_35 : f32 to vector<1x8x512xf32>
      %c0_36 = arith.constant 0 : index
      %c0_37 = arith.constant 0 : index
      %c0_38 = arith.constant 0 : index
      %31 = vector.load %arg6[%c0_36, %c0_37, %c0_38] : memref<1x8x512xf32, #tpu.memory_space<vmem>>, vector<1x8x512xf32>
      tpu.vector_store %arg6[%c0_36, %c0_37, %c0_38], %30 {strides = array<i32>} : memref<1x8x512xf32, #tpu.memory_space<vmem>>, vector<1x8x512xf32>,
    } else {
    }
    %c0 = arith.constant 0 : index
    %c0_1 = arith.constant 0 : index
    %c0_2 = arith.constant 0 : index
    %3 = vector.load %arg2[%c0, %c0_1, %c0_2] : memref<1x8x512xf32, #tpu.memory_space<vmem>>, vector<1x8x512xf32>
    %c0_3 = arith.constant 0 : index
    %c0_4 = arith.constant 0 : index
    %c0_5 = arith.constant 0 : index
    %4 = vector.load %arg3[%c0_3, %c0_4, %c0_5] : memref<1x8x512xf32, #tpu.memory_space<vmem>>, vector<1x8x512xf32>
    %5 = arith.negf %3 : vector<1x8x512xf32>
    %6 = math.exp %5 : vector<1x8x512xf32>
    %cst = arith.constant 1.000000e+00 : f32
    %7 = vector.broadcast %cst : f32 to vector<1x8x512xf32>
    %8 = arith.addf %7, %6 : vector<1x8x512xf32>
    %9 = arith.divf %7, %8 : vector<1x8x512xf32>
    %c0_6 = arith.constant 0 : index
    %c0_7 = arith.constant 0 : index
    %c0_8 = arith.constant 0 : index
    %10 = vector.load %arg4[%c0_6, %c0_7, %c0_8] : memref<1x8x512xf32, #tpu.memory_space<vmem>>, vector<1x8x512xf32>
    %11 = arith.mulf %9, %4 : vector<1x8x512xf32>
    %cst_9 = arith.constant dense<0.000000e+00> : vector<8x512xf32>
    %12 = vector.multi_reduction <add>, %11, %cst_9 [0] : vector<1x8x512xf32> to vector<8x512xf32>
    %13 = vector.shape_cast %12 : vector<8x512xf32> to vector<1x8x512xf32>
    %14 = arith.addf %10, %13 : vector<1x8x512xf32>
    %c0_10 = arith.constant 0 : index
    %c0_11 = arith.constant 0 : index
    %c0_12 = arith.constant 0 : index
    %15 = vector.load %arg4[%c0_10, %c0_11, %c0_12] : memref<1x8x512xf32, #tpu.memory_space<vmem>>, vector<1x8x512xf32>
    tpu.vector_store %arg4[%c0_10, %c0_11, %c0_12], %14 {strides = array<i32>} : memref<1x8x512xf32, #tpu.memory_space<vmem>>, vector<1x8x512xf32>,
    %c0_13 = arith.constant 0 : index
    %c0_14 = arith.constant 0 : index
    %c0_15 = arith.constant 0 : index
    %16 = vector.load %arg5[%c0_13, %c0_14, %c0_15] : memref<1x8x512xf32, #tpu.memory_space<vmem>>, vector<1x8x512xf32>
    %cst_16 = arith.constant dense<0.000000e+00> : vector<8x512xf32>
    %17 = vector.multi_reduction <add>, %9, %cst_16 [0] : vector<1x8x512xf32> to vector<8x512xf32>
    %18 = vector.shape_cast %17 : vector<8x512xf32> to vector<1x8x512xf32>
    %19 = arith.addf %16, %18 : vector<1x8x512xf32>
    %c0_17 = arith.constant 0 : index
    %c0_18 = arith.constant 0 : index
    %c0_19 = arith.constant 0 : index
    %20 = vector.load %arg5[%c0_17, %c0_18, %c0_19] : memref<1x8x512xf32, #tpu.memory_space<vmem>>, vector<1x8x512xf32>
    tpu.vector_store %arg5[%c0_17, %c0_18, %c0_19], %19 {strides = array<i32>} : memref<1x8x512xf32, #tpu.memory_space<vmem>>, vector<1x8x512xf32>,
    %c0_20 = arith.constant 0 : index
    %c0_21 = arith.constant 0 : index
    %c0_22 = arith.constant 0 : index
    %21 = vector.load %arg6[%c0_20, %c0_21, %c0_22] : memref<1x8x512xf32, #tpu.memory_space<vmem>>, vector<1x8x512xf32>
    %cst_23 = arith.constant dense<0.000000e+00> : vector<8x512xf32>
    %22 = vector.multi_reduction <add>, %4, %cst_23 [0] : vector<1x8x512xf32> to vector<8x512xf32>
    %23 = vector.shape_cast %22 : vector<8x512xf32> to vector<1x8x512xf32>
    %24 = arith.addf %21, %23 : vector<1x8x512xf32>
    %c0_24 = arith.constant 0 : index
    %c0_25 = arith.constant 0 : index
    %c0_26 = arith.constant 0 : index
    %25 = vector.load %arg6[%c0_24, %c0_25, %c0_26] : memref<1x8x512xf32, #tpu.memory_space<vmem>>, vector<1x8x512xf32>
    tpu.vector_store %arg6[%c0_24, %c0_25, %c0_26], %24 {strides = array<i32>} : memref<1x8x512xf32, #tpu.memory_space<vmem>>, vector<1x8x512xf32>,
    return
  }
  func.func @transform_0(%arg0: i32, %arg1: i32) -> (i32, i32, i32) {
    %c1_i32 = arith.constant 1 : i32
    %0 = arith.muli %arg0, %c1_i32 : i32
    %1 = arith.addi %0, %arg1 : i32
    %c0_i32 = arith.constant 0 : i32
    %c0_i32_0 = arith.constant 0 : i32
    %c0_i32_1 = arith.constant 0 : i32
    return %1, %c0_i32, %c0_i32_0 : i32, i32, i32
  }
  func.func @transform_1(%arg0: i32, %arg1: i32) -> (i32, i32, i32) {
    %c1_i32 = arith.constant 1 : i32
    %0 = arith.muli %arg0, %c1_i32 : i32
    %1 = arith.addi %0, %arg1 : i32
    %c0_i32 = arith.constant 0 : i32
    %c0_i32_0 = arith.constant 0 : i32
    %c0_i32_1 = arith.constant 0 : i32
    return %1, %c0_i32, %c0_i32_0 : i32, i32, i32
  }
  func.func @transform_2(%arg0: i32, %arg1: i32) -> (i32, i32, i32) {
    %c0_i32 = arith.constant 0 : i32
    %c0_i32_0 = arith.constant 0 : i32
    %c0_i32_1 = arith.constant 0 : i32
    return %arg0, %c0_i32, %c0_i32_0 : i32, i32, i32
  }
  func.func @transform_3(%arg0: i32, %arg1: i32) -> (i32, i32, i32) {
    %c0_i32 = arith.constant 0 : i32
    %c0_i32_0 = arith.constant 0 : i32
    %c0_i32_1 = arith.constant 0 : i32
    return %arg0, %c0_i32, %c0_i32_0 : i32, i32, i32
  }
  func.func @transform_4(%arg0: i32, %arg1: i32) -> (i32, i32, i32) {
    %c0_i32 = arith.constant 0 : i32
    %c0_i32_0 = arith.constant 0 : i32
    %c0_i32_1 = arith.constant 0 : i32
    return %arg0, %c0_i32, %c0_i32_0 : i32, i32, i32
  }
}

</mosaic_0001>

<bundles_post_ra>
// kernel: tpu_custom_call.1
= control target key start
LH: loop header
LB: loop body
LE: loop exit
PB: predicated region body
PF: predicated region fallthrough
CT: control target
= control target key end

     0   :  { %10 = vsyncpa [#allocation3], 0  ;;  %s441_s0 = inlined_call_operand.hbm [shape: f32[1,8,512], index: 0, kind: input, shape index: {}]   ;;  %s442_s1 = inlined_call_operand.hbm [shape: f32[1,8,512], index: 1, kind: input, shape index: {}]   ;;  %s443_s2 = inlined_call_operand.hbm [shape: f32[1,8,512], index: 2, kind: output, shape index: {0}]   ;;  %s444_s3 = inlined_call_operand.hbm [shape: f32[1,8,512], index: 3, kind: output, shape index: {1}]   ;;  %s445_s4 = inlined_call_operand.hbm [shape: f32[1,8,512], index: 4, kind: output, shape index: {2}]  }
   0x1   :  { %11 = vsyncpa [#allocation6], 0 }
   0x2   :  { %12 = vsyncpa [#allocation4], 0 }
   0x3   :  { %13 = vsyncpa [#allocation9], 0  ;;  %s337_s15 = smov [#allocation2]   ;;  %s338_s17 = smov [#allocation5]  }
   0x4   :  { %s24_s16 = sshll.u32 %s337_s15, 4  ;;  %s38_s18 = sshll.u32 %s338_s17, 4  ;;  %s25_s16 = int_to_ptr.vmem [resolvable:$true] %s24_s16  ;;  %s39_s18 = int_to_ptr.vmem [resolvable:$true] %s38_s18 }
   0x5   :  { %s219_s21 = scalar_lea.hbm %s441_s0, 512 }
   0x6   :  { %p220_p0 = scmp.ne.s32.totalorder %s441_s0, %s219_s21  ;;  %p223_p1 = scmp.lt.u32.totalorder %s219_s21, %s441_s0 }
   0x8   :  { %p225_p2 = pnand %p223_p1, %p220_p0 }
   0xa   :  { %228 = shalt.err (!%p225_p2)
}
   0xb   :  { %s229_s26 = scalar_lea.vmem %s25_s16, 512  ;;  %p234_p4 = scmp.lt.s32.totalorder %s25_s16, %s25_s16 }
   0xc   :  { %p230_p3 = scmp.ne.s32.totalorder %s25_s16, %s229_s26  ;;  %p235_p5 = scmp.lt.s32.totalorder %s229_s26, %s229_s26 }
   0xe   :  { %p236_p6 = por %p235_p5, %p234_p4 }
  0x10   :  { %p237_p7 = pnand %p236_p6, %p230_p3 }
  0x12   :  { %240 = shalt.err (!%p237_p7)
}
  0x13   :  { %27 = dma.hbm_to_vmem [thread:$0]  %s441_s0, 512, %s25_s16, [#allocation3]  }
  0x14   :  { %s241_s5 = scalar_lea.hbm %s442_s1, 512 }
  0x15   :  { %p242_p8 = scmp.ne.s32.totalorder %s442_s1, %s241_s5  ;;  %p245_p9 = scmp.lt.u32.totalorder %s241_s5, %s442_s1 }
  0x17   :  { %p247_p10 = pnand %p245_p9, %p242_p8 }
  0x19   :  { %250 = shalt.err (!%p247_p10)
}
  0x1a   :  { %s251_s10 = scalar_lea.vmem %s39_s18, 512  ;;  %p256_p12 = scmp.lt.s32.totalorder %s39_s18, %s39_s18 }
  0x1b   :  { %p252_p11 = scmp.ne.s32.totalorder %s39_s18, %s251_s10  ;;  %p257_p13 = scmp.lt.s32.totalorder %s251_s10, %s251_s10 }
  0x1d   :  { %p258_p0 = por %p257_p13, %p256_p12 }
  0x1f   :  { %p259_p1 = pnand %p258_p0, %p252_p11 }
  0x21   :  { %262 = shalt.err (!%p259_p1)
}
  0x22   :  { %41 = dma.hbm_to_vmem [thread:$0]  %s442_s1, 512, %s39_s18, [#allocation6]  }
  0x23   :  { %329 = dma.done.wait [#allocation3], 512  }
  0x24   :  { %330 = vsyncadd [#allocation3], 4294966784 }
  0x25   :  { %331 = dma.done.wait [#allocation6], 512  }
  0x26   :  { %332 = vsyncadd [#allocation6], 4294966784  ;;  %v66_v0 = vld [vmem:[#allocation2] sm:$0xff]  ;;  %v67_v1 = vld [vmem:[#allocation2 + $0x8] sm:$0xff]  ;;  %s339_s1 = smov [#allocation8]   ;;  %s340_s13 = smov [#allocation10]  }
  0x27   :  { %v68_v2 = vld [vmem:[#allocation2 + $0x10] sm:$0xff]  ;;  %v193_v3 = vmul.f32 -1.442695, %v66_v0  ;;  %v194_v4 = vmul.f32 -1.442695, %v67_v1  ;;  %v69_v6 = vld [vmem:[#allocation2 + $0x18] sm:$0xff] }
  0x28   :  { %v195_v5 = vmul.f32 -1.442695, %v68_v2  ;;  %v70_v7 = vld [vmem:[#allocation5] sm:$0xff]  ;;  %v71_v8 = vld [vmem:[#allocation5 + $0x8] sm:$0xff]  ;;  %v196_v9 = vmul.f32 -1.442695, %v69_v6 }
  0x29   :  { %203 = vpow2.f32 %v193_v3  ;;  %v72_v10 = vld [vmem:[#allocation5 + $0x10] sm:$0xff]  ;;  %v73_v11 = vld [vmem:[#allocation5 + $0x18] sm:$0xff]  ;;  %146 = vst [vmem:[#allocation10] sm:$0xff] %v70_v7  ;;  %147 = vst [vmem:[#allocation10 + $0x8] sm:$0xff] %v71_v8  ;;  %s166_s12 = sshll.u32 %s339_s1, 4  ;;  %s176_s14 = sshll.u32 %s340_s13, 4  ;;  %s167_s12 = int_to_ptr.vmem [resolvable:$true] %s166_s12  ;;  %s391_s14 = int_to_ptr.vmem [resolvable:$true] %s176_s14 }
  0x2a   :  { %205 = vpow2.f32 %v194_v4  ;;  %148 = vst [vmem:[#allocation10 + $0x10] sm:$0xff] %v72_v10  ;;  %149 = vst [vmem:[#allocation10 + $0x18] sm:$0xff] %v73_v11  ;;  %s341_s15 = smov [#allocation7]   ;;  %s263_s17 = scalar_lea.vmem %s167_s12, 512 }
  0x2b   :  { %207 = vpow2.f32 %v195_v5  ;;  %s156_s16 = sshll.u32 %s341_s15, 4  ;;  %p264_p2 = scmp.ne.s32.totalorder %s167_s12, %s263_s17  ;;  %s393_s16 = int_to_ptr.vmem [resolvable:$true] %s156_s16 }
  0x2c   :  { %209 = vpow2.f32 %v196_v9  ;;  %p268_p3 = scmp.lt.s32.totalorder %s167_s12, %s167_s12  ;;  %p269_p4 = scmp.lt.s32.totalorder %s263_s17, %s263_s17 }
  0x2e   :  { %p270_p5 = por %p269_p4, %p268_p3 }
  0x30   :  { %p271_p6 = pnand %p270_p5, %p264_p2 }
  0x33   :  { %v204_v12 = vpop.eup %203 }
  0x34   :  { %v206_v13 = vpop.eup %205  ;;  %v86_v14 = vadd.f32 1.0, %v204_v12 }
  0x35   :  { %v208_v15 = vpop.eup %207  ;;  %v87_v16 = vadd.f32 1.0, %v206_v13 }
  0x36   :  { %v210_v17 = vpop.eup %209  ;;  %211 = vrcp.f32 %v86_v14  ;;  %v88_v18 = vadd.f32 1.0, %v208_v15 }
  0x37   :  { %213 = vrcp.f32 %v87_v16  ;;  %v89_v19 = vadd.f32 1.0, %v210_v17 }
  0x38   :  { %215 = vrcp.f32 %v88_v18 }
  0x39   :  { %217 = vrcp.f32 %v89_v19 }
  0x40   :  { %v212_v20 = vpop.eup %211 }
  0x41   :  { %v214_v21 = vpop.eup %213  ;;  %v102_v22 = vmul.f32 %v212_v20, %v70_v7  ;;  %130 = vst [vmem:[#allocation8] sm:$0xff] %v212_v20 }
  0x42   :  { %v216_v23 = vpop.eup %215  ;;  %v103_v24 = vmul.f32 %v214_v21, %v71_v8  ;;  %131 = vst [vmem:[#allocation8 + $0x8] sm:$0xff] %v214_v21 }
  0x43   :  { %v218_v25 = vpop.eup %217  ;;  %v104_v26 = vmul.f32 %v216_v23, %v72_v10  ;;  %132 = vst [vmem:[#allocation8 + $0x10] sm:$0xff] %v216_v23  ;;  %114 = vst [vmem:[#allocation7] sm:$0xff] %v102_v22 }
  0x44   :  { %v105_v27 = vmul.f32 %v218_v25, %v73_v11  ;;  %133 = vst [vmem:[#allocation8 + $0x18] sm:$0xff] %v218_v25  ;;  %115 = vst [vmem:[#allocation7 + $0x8] sm:$0xff] %v103_v24 }
  0x45   :  { %116 = vst [vmem:[#allocation7 + $0x10] sm:$0xff] %v104_v26 }
  0x46   :  { %274 = shalt.err (!%p271_p6)
}
  0x47   :  { %s275_s20 = scalar_lea.hbm %s444_s3, 512 }
  0x48   :  { %p276_p7 = scmp.ne.s32.totalorder %s444_s3, %s275_s20  ;;  %p279_p8 = scmp.lt.u32.totalorder %s275_s20, %s444_s3 }
  0x4a   :  { %p281_p9 = pnand %p279_p8, %p276_p7 }
  0x4c   :  { %284 = shalt.err (!%p281_p9)
}
  0x4d   :  { %169 = dma.vmem_to_hbm [thread:$0]  %s167_s12, 512, %s444_s3, [#allocation9]   ;;  %117 = vst [vmem:[#allocation7 + $0x18] sm:$0xff] %v105_v27 }
  0x4e   :  { %s285_s27 = scalar_lea.vmem %s391_s14, 512  ;;  %p290_p11 = scmp.lt.s32.totalorder %s391_s14, %s391_s14 }
  0x4f   :  { %p286_p10 = scmp.ne.s32.totalorder %s391_s14, %s285_s27  ;;  %p291_p12 = scmp.lt.s32.totalorder %s285_s27, %s285_s27 }
  0x51   :  { %p292_p13 = por %p291_p12, %p290_p11 }
  0x53   :  { %p293_p0 = pnand %p292_p13, %p286_p10 }
  0x55   :  { %296 = shalt.err (!%p293_p0)
}
  0x56   :  { %s297_s30 = scalar_lea.hbm %s445_s4, 512 }
  0x57   :  { %p298_p1 = scmp.ne.s32.totalorder %s445_s4, %s297_s30  ;;  %p301_p2 = scmp.lt.u32.totalorder %s297_s30, %s445_s4 }
  0x59   :  { %p303_p3 = pnand %p301_p2, %p298_p1 }
  0x5b   :  { %306 = shalt.err (!%p303_p3)
}
  0x5c   :  { %179 = dma.vmem_to_hbm [thread:$0]  %s391_s14, 512, %s445_s4, [#allocation9]  }
  0x5d   :  { %s307_s10 = scalar_lea.vmem %s393_s16, 512  ;;  %p312_p5 = scmp.lt.s32.totalorder %s393_s16, %s393_s16 }
  0x5e   :  { %p308_p4 = scmp.ne.s32.totalorder %s393_s16, %s307_s10  ;;  %p313_p6 = scmp.lt.s32.totalorder %s307_s10, %s307_s10 }
  0x60   :  { %p314_p7 = por %p313_p6, %p312_p5 }
  0x62   :  { %p315_p8 = pnand %p314_p7, %p308_p4 }
  0x64   :  { %318 = shalt.err (!%p315_p8)
}
  0x65   :  { %s319_s1 = scalar_lea.hbm %s443_s2, 512 }
  0x66   :  { %p320_p9 = scmp.ne.s32.totalorder %s443_s2, %s319_s1  ;;  %p323_p10 = scmp.lt.u32.totalorder %s319_s1, %s443_s2 }
  0x68   :  { %p325_p11 = pnand %p323_p10, %p320_p9 }
  0x6a   :  { %328 = shalt.err (!%p325_p11)
}
  0x6b   :  { %159 = dma.vmem_to_hbm [thread:$0]  %s393_s16, 512, %s443_s2, [#allocation4]  }
  0x6c   :  { %333 = dma.done.wait [#allocation4], 512  }
  0x6d   :  { %334 = vsyncadd [#allocation4], 4294966784 }
  0x6e   :  { %335 = dma.done.wait [#allocation9], 1024  }
  0x6f   :  { %336 = vsyncadd [#allocation9], 4294966272 }
  0x70   :  { %189 = vsyncpa [#allocation3], 1 }
  0x71   :  { %190 = vsyncpa [#allocation6], 1 }
  0x72   :  { %191 = vsyncpa [#allocation4], 1 }
  0x73   :  { %192 = vsyncpa [#allocation9], 1 }

</bundles_post_ra>
